<compile_context>
chip_gen: v5e
topology: v5e:2x2
jax: 0.10.0
libtpu: 0.0.40
codegen_flags: <defaults>
</compile_context>

<pallas_src>
import functools

import numpy as np
import jax
import jax.numpy as jnp
from jax.experimental import pallas as pl
from jax.experimental.pallas import tpu as pltpu


_ROLL_MATCHES_JNP = None


def _detect_roll_direction():
    """pltpu.roll is expected to follow jnp.roll semantics; verify once with a
    tiny probe kernel so the conv tap shifts rotate the right way on any jax
    version.  The result is cached (the probe uses only concrete arrays, so it
    is safe to hit this lazily even while tracing the main forward)."""
    global _ROLL_MATCHES_JNP
    if _ROLL_MATCHES_JNP is None:
        def probe(x_ref, o_ref):
            o_ref[...] = pltpu.roll(x_ref[...], 1, axis=1)

        x = jnp.tile(jnp.arange(128, dtype=jnp.float32)[None, :], (8, 1))
        y = pl.pallas_call(
            probe, out_shape=jax.ShapeDtypeStruct((8, 128), jnp.float32)
        )(x)
        _ROLL_MATCHES_JNP = bool(jnp.array_equal(y, jnp.roll(x, 1, axis=1)))
    return _ROLL_MATCHES_JNP


def _shift_lanes(x, s, roll_matches_jnp):
    """y[:, p] = x[:, (p + s) % L] (circular lane rotation on the XLU; the
    wrapped entries only ever land in border/guard outputs, which are masked
    to zero afterwards)."""
    if s == 0:
        return x
    n = x.shape[-1]
    amount = (-s) % n if roll_matches_jnp else s % n
    return pltpu.roll(x, amount, axis=1)


def _conv3x3_kernel(x_ref, w_ref, b_ref, m_ref, *rest, padded_w, activation,
                    has_residual, roll_matches_jnp):
    """Fused 3x3 conv (stride 1, zero pad 1) + bias + activation (+ residual).

    x_ref   : (1, Cin, L)    padded-flat input (zero spatial border + lane guard)
    w_ref   : (9, Cout, Cin) conv taps, (ky, kx) row-major
    b_ref   : (Cout, 1)
    m_ref   : (1, L)         1.0 on interior pixels, 0.0 on border/guard lanes
    res_ref : (1, Cout, L)   optional residual, same layout
    o_ref   : (1, Cout, L)
    """
    if has_residual:
        res_ref, o_ref = rest
    else:
        (o_ref,) = rest

    x = x_ref[0].astype(jnp.float32)                       # (Cin, L)

    acc = None
    for dy in (-1, 0, 1):
        for dx in (-1, 0, 1):
            tap = (dy + 1) * 3 + (dx + 1)                  # == ky * 3 + kx
            xs = _shift_lanes(x, dy * padded_w + dx, roll_matches_jnp)
            part = jnp.dot(w_ref[tap], xs,
                           preferred_element_type=jnp.float32)
            acc = part if acc is None else acc + part

    acc = acc + b_ref[...].astype(jnp.float32)             # (Cout,1) bcast lanes
    if activation == "leaky_relu":
        acc = jnp.where(acc >= 0, acc, 0.1 * acc)
    elif activation == "relu":
        acc = jnp.maximum(acc, 0.0)
    acc = acc * m_ref[...].astype(jnp.float32)             # re-zero the border
    if has_residual:
        acc = acc + res_ref[0].astype(jnp.float32)

    o_ref[0] = acc.astype(o_ref.dtype)


def _fused_conv3x3(x_pf, weight, bias, mask, padded_w, *, activation,
                   residual=None):
    """One fused conv3x3(+bias+activation[+residual]) pallas_call.

    x_pf: (B, Cin, L) padded-flat activations; weight: (Cout, Cin, 3, 3)
    PyTorch layout; bias: (Cout,); mask: (1, L)."""
    bsz, cin, lanes = x_pf.shape
    cout = weight.shape[0]
    w_taps = jnp.transpose(weight, (2, 3, 0, 1)).reshape(9, cout, cin)
    bias2d = bias.reshape(cout, 1)

    has_residual = residual is not None
    kernel = functools.partial(
        _conv3x3_kernel,
        padded_w=padded_w,
        activation=activation,
        has_residual=has_residual,
        roll_matches_jnp=_detect_roll_direction(),
    )

    in_specs = [
        pl.BlockSpec((1, cin, lanes), lambda b: (b, 0, 0)),
        pl.BlockSpec((9, cout, cin), lambda b: (0, 0, 0)),
        pl.BlockSpec((cout, 1), lambda b: (0, 0)),
        pl.BlockSpec((1, lanes), lambda b: (0, 0)),
    ]
    args = [x_pf, w_taps, bias2d, mask]
    if has_residual:
        in_specs.append(pl.BlockSpec((1, cout, lanes), lambda b: (b, 0, 0)))
        args.append(residual)

    return pl.pallas_call(
        kernel,
        out_shape=jax.ShapeDtypeStruct((bsz, cout, lanes), x_pf.dtype),
        grid_spec=pltpu.PrefetchScalarGridSpec(
            num_scalar_prefetch=0,
            grid=(bsz,),
            in_specs=in_specs,
            out_specs=pl.BlockSpec((1, cout, lanes), lambda b: (b, 0, 0)),
        ),
        compiler_params=pltpu.CompilerParams(
            dimension_semantics=("parallel",),
        ),
    )(*args)


def conv_res_block_forward(x, params):
    """ConvResBlock.forward: conv3x3 -> LeakyReLU(0.1) -> num_block residual
    blocks (y = y + conv2(relu(conv1(y))))."""
    bsz, cin, h, w = x.shape
    hp, wp = h + 2, w + 2
    p_real = hp * wp
    lanes = ((p_real + 127) // 128) * 128          # lane-aligned flat width

    # Interior mask: 1.0 on the original HxW pixels, 0.0 on the zero border and
    # on the lane-alignment guard.  Built with numpy at trace time.
    m2d = np.zeros((hp, wp), np.float32)
    m2d[1:-1, 1:-1] = 1.0
    mask_np = np.zeros((1, lanes), np.float32)
    mask_np[0, :p_real] = m2d.reshape(-1)
    mask = jnp.asarray(mask_np)

    # Pad the input ONCE; every intermediate activation keeps this padded-flat
    # layout with a zero border, so no further XLA-side pads/transposes occur.
    x_sp = jnp.pad(x, ((0, 0), (0, 0), (1, 1), (1, 1)))            # (B,C,hp,wp)
    x_pf = jnp.pad(x_sp.reshape(bsz, cin, p_real),
                   ((0, 0), (0, 0), (0, lanes - p_real)))          # (B,C,L)

    y = _fused_conv3x3(x_pf, params["w0"], params["b0"], mask, wp,
                       activation="leaky_relu")
    for blk in params["blocks"]:
        t = _fused_conv3x3(y, blk["w1"], blk["b1"], mask, wp,
                           activation="relu")
        y = _fused_conv3x3(t, blk["w2"], blk["b2"], mask, wp,
                           activation="none", residual=y)

    cout = params["w0"].shape[0]
    y = y[:, :, :p_real].reshape(bsz, cout, hp, wp)
    return y[:, :, 1:h + 1, 1:w + 1]


# ----------------------------- pure-JAX reference ---------------------------


def _ref_conv3x3(x, w, b):
    y = jax.lax.conv_general_dilated(
        x, w, window_strides=(1, 1), padding=((1, 1), (1, 1)),
        dimension_numbers=("NCHW", "OIHW", "NCHW"),
        precision=jax.lax.Precision.HIGHEST)
    return y + b.reshape(1, -1, 1, 1)


def _ref_forward(x, params):
    y = _ref_conv3x3(x, params["w0"], params["b0"])
    y = jnp.where(y >= 0, y, 0.1 * y)
    for blk in params["blocks"]:
        t = jnp.maximum(_ref_conv3x3(y, blk["w1"], blk["b1"]), 0.0)
        y = y + _ref_conv3x3(t, blk["w2"], blk["b2"])
    return y


def _init_conv(key, cout, cin):
    kw, kb = jax.random.split(key)
    bound = 1.0 / np.sqrt(cin * 9)     # PyTorch default Conv2d init range
    w = jax.random.uniform(kw, (cout, cin, 3, 3), jnp.float32, -bound, bound)
    b = jax.random.uniform(kb, (cout,), jnp.float32, -bound, bound)
    return w, b


if __name__ == "__main__":
    key = jax.random.PRNGKey(0)
    B, IN_FEAT, OUT_FEAT, H, W = 2, 4, 64, 16, 16
    NUM_BLOCK = 3        # module default is 30; kept small for the smoke test

    kx, k0, kb = jax.random.split(key, 3)
    x = jax.random.normal(kx, (B, IN_FEAT, H, W), dtype=jnp.float32)

    w0, b0 = _init_conv(k0, OUT_FEAT, IN_FEAT)
    blocks = []
    for i in range(NUM_BLOCK):
        w1, b1 = _init_conv(jax.random.fold_in(kb, 2 * i), OUT_FEAT, OUT_FEAT)
        w2, b2 = _init_conv(jax.random.fold_in(kb, 2 * i + 1), OUT_FEAT, OUT_FEAT)
        blocks.append({"w1": w1, "b1": b1, "w2": w2, "b2": b2})
    params = {"w0": w0, "b0": b0, "blocks": blocks}

    _detect_roll_direction()                     # prime the cached probe (eager)

    y = jax.jit(conv_res_block_forward)(x, params)
    y = jax.block_until_ready(y)

    ref = _ref_forward(x, params)
    assert y.shape == ref.shape == (B, OUT_FEAT, H, W)
    err = float(jnp.max(jnp.abs(y - ref)))
    assert jnp.allclose(y, ref, atol=1e-3, rtol=1e-3), f"max abs err {err}"

    print("KERNEL_OK")
</pallas_src>

<mosaic_0001>
module attributes {stable_mosaic.version = 11 : i64} {
  func.func @probe(%arg0: memref<8x128xf32, #tpu.memory_space<vmem>>, %arg1: memref<8x128xf32, #tpu.memory_space<vmem>>) attributes {dimension_semantics = [], scalar_prefetch = 0 : i64, scratch_operands = 0 : i64, tpu.core_type = #tpu.core_type<tc>} {
    %c0 = arith.constant 0 : index
    %c0_0 = arith.constant 0 : index
    %0 = vector.load %arg0[%c0, %c0_0] : memref<8x128xf32, #tpu.memory_space<vmem>>, vector<8x128xf32>
    %c1_i32 = arith.constant 1 : i32
    %1 = tpu.dynamic_rotate %0 by %c1_i32 dim 1 : vector<8x128xf32>, i32 -> vector<8x128xf32>
    %c0_1 = arith.constant 0 : index
    %c0_2 = arith.constant 0 : index
    %2 = vector.load %arg1[%c0_1, %c0_2] : memref<8x128xf32, #tpu.memory_space<vmem>>, vector<8x128xf32>
    tpu.vector_store %arg1[%c0_1, %c0_2], %1 {strides = array<i32>} : memref<8x128xf32, #tpu.memory_space<vmem>>, vector<8x128xf32>,
    return
  }
}

</mosaic_0001>

<bundles_post_ra>
// kernel: tpu_custom_call.1
= control target key start
LH: loop header
LB: loop body
LE: loop exit
PB: predicated region body
PF: predicated region fallthrough
CT: control target
= control target key end

     0   :  { %6 = vsyncpa [#allocation3], 0  ;;  %s118_s0 = inlined_call_operand.hbm [shape: f32[8,128], index: 0, kind: input, shape index: {}]   ;;  %s119_s1 = inlined_call_operand.hbm [shape: f32[8,128], index: 1, kind: output, shape index: {}]  }
   0x1   :  { %7 = vsyncpa [#allocation4], 0  ;;  %s13_s8 = sshll.u32 %s118_s0, 4  ;;  %s99_s9 = smov [#allocation2]   ;;  %s14_s8 = int_to_ptr.hbm [resolvable:$true] %s13_s8 }
   0x2   :  { %s15_s10 = sshll.u32 %s99_s9, 4  ;;  %s16_s10 = int_to_ptr.vmem [resolvable:$true] %s15_s10 }
   0x3   :  { %18 = dma.hbm_to_vmem [thread:$0]  %s14_s8, 128, %s16_s10, [#allocation3]  }
   0x4   :  { %95 = dma.done.wait [#allocation3], 128  }
   0x5   :  { %96 = vsyncadd [#allocation3], 4294967168  ;;  %v23_v0 = vld [vmem:[#allocation2] sm:$0xff]  ;;  %s100_s11 = smov 1   ;;  %s101_s12 = smov [#allocation5]  }
   0x6   :  { %24 = vrot.lane.b32.xlu0 %v23_v0, %s100_s11  ;;  %s32_s13 = sshll.u32 %s101_s12, 4  ;;  %s34_s16 = sshll.u32 %s119_s1, 4  ;;  %s33_s13 = int_to_ptr.vmem [resolvable:$true] %s32_s13  ;;  %s35_s16 = int_to_ptr.hbm [resolvable:$true] %s34_s16 }
  0x78   :  { %v25_v1 = vpop.permute.xlu0 %24 }
  0x79   :  { %26 = vst [vmem:[#allocation5] sm:$0xff] %v25_v1 }
  0x7a   :  { %37 = dma.vmem_to_hbm [thread:$0]  %s33_s13, 128, %s35_s16, [#allocation4]  }
  0x7b   :  { %97 = dma.done.wait [#allocation4], 128  }
  0x7c   :  { %98 = vsyncadd [#allocation4], 4294967168 }
  0x7d   :  { %42 = vsyncpa [#allocation3], 1 }
  0x7e   :  { %43 = vsyncpa [#allocation4], 1 }

</bundles_post_ra>
